<compile_context>
chip_gen: v5e
topology: v5e:2x2
jax: 0.10.0
libtpu: 0.0.40
codegen_flags: <defaults>
</compile_context>

<pallas_src>
import functools
import math

import jax
import jax.numpy as jnp
from jax.experimental import pallas as pl
from jax.experimental.pallas import tpu as pltpu


_RESIDENT_BYTES = 8 << 20      # keep adj-pass RHS fully VMEM-resident if one copy <= 8 MiB
_VMEM_LIMIT_CAP = 56 << 20     # stay safely under v7x's 64 MiB physical VMEM


def _round_up(x, m):
    return ((x + m - 1) // m) * m


def _divisor_tile(total, preferred):
    """Largest tile <= preferred that exactly divides `total` (halving search)."""
    t = min(preferred, total)
    while total % t != 0:
        t //= 2
    return max(t, 1)


def _pad2(a, rows, cols, dtype):
    """Zero-pad a 2-D array to (rows, cols) and cast.

    No-op when already padded (and a pure cast when only the dtype differs), so
    callers that pre-align / pre-cast their arrays pay nothing here."""
    r, c = a.shape
    a = a.astype(dtype)
    if r == rows and c == cols:
        return a
    return jnp.zeros((rows, cols), dtype).at[:r, :c].set(a)


def _adj_tiles(N, f_p):
    """Tile sizes (tm, tk, tn) for the (N, N) @ (N, f_p) adjacency pass."""
    n8 = _round_up(N, 8)
    if f_p <= 512:
        tm_pref, tk_pref = 1024, 2048          # 1024x2048 bf16 adj tile = 4 MiB
    else:
        tm_pref, tk_pref = 512, 1024
    tn = f_p if f_p <= 2048 else _divisor_tile(f_p, 512)

    tm = min(tm_pref, n8)
    tk = min(tk_pref, n8)
    # Shrink a tile if zero-padding waste would exceed ~25% of N (floor 256).
    while tm > 256 and (_round_up(N, tm) - N) * 4 > N:
        tm //= 2
    while tk > 256 and (_round_up(N, tk) - N) * 4 > N:
        tk //= 2
    # Keep >= 2 row tiles for larger graphs so the "parallel" row axis can feed
    # both v7x TensorCores.
    if _round_up(N, tm) // tm == 1 and N > 512:
        tm = _round_up(tm // 2, 8)
    return tm, tk, tn


# ---------------------------------------------------------------------------
# Adjacency pass: out = adj @ M (+ bias).  The f32 output block is the
# accumulator (same block index across the reduction axis) -- no VMEM scratch.
# ---------------------------------------------------------------------------
def _adj_mm_kernel(*refs, has_bias, resident, tk):
    if has_bias:
        adj_ref, m_ref, b_ref, o_ref = refs
    else:
        adj_ref, m_ref, o_ref = refs
        b_ref = None
    k = pl.program_id(2)

    @pl.when(k == 0)
    def _init():
        o_ref[...] = jnp.zeros_like(o_ref)

    if resident:
        # m_ref holds the whole (cols_pad, f_p) operand; slice the k-th row band.
        m_blk = m_ref[pl.ds(pl.multiple_of(k * tk, 8), tk), :]
    else:
        # m_ref is the (tk, tn) tile for this grid step.
        m_blk = m_ref[...]
    o_ref[...] += jnp.dot(adj_ref[...], m_blk, preferred_element_type=jnp.float32)

    if has_bias:
        @pl.when(k == pl.num_programs(2) - 1)
        def _finalize():
            o_ref[...] += b_ref[...]


def _adj_matmul(adj, m_p, bias, *, tm, tk, tn, rows_pad, cols_pad, f_p,
                compute_dtype, resident):
    """f32 (rows_pad, f_p) result of pad(adj) @ m_p (+ bias).

    adj: (N, N)   -- padded/cast here (no-op if caller already aligned it).
    m_p: (cols_pad, f_p) in compute_dtype (already padded)."""
    csize = jnp.dtype(compute_dtype).itemsize
    adj_p = _pad2(adj, rows_pad, cols_pad, compute_dtype)

    grid = (rows_pad // tm, f_p // tn, cols_pad // tk)
    num_i, num_j, _ = grid
    has_bias = bias is not None

    in_specs = [pl.BlockSpec((tm, tk), lambda i, j, k: (i, k))]
    if resident:
        # Constant block index -> loaded into VMEM once, never re-streamed.
        in_specs.append(pl.BlockSpec((cols_pad, f_p), lambda i, j, k: (0, 0)))
    else:
        in_specs.append(pl.BlockSpec((tk, tn), lambda i, j, k: (k, j)))
    args = [adj_p, m_p]
    if has_bias:
        b_p = _pad2(bias.reshape(1, -1), 1, f_p, jnp.float32)
        in_specs.append(pl.BlockSpec((1, tn), lambda i, j, k: (0, j)))
        args.append(b_p)

    # Double-buffered VMEM budget -> explicit scoped-VMEM limit.
    vmem_need = 2 * tm * tk * csize + 2 * tm * tn * 4
    vmem_need += (2 * cols_pad * f_p * csize) if resident else (2 * tk * tn * csize)
    if has_bias:
        vmem_need += 2 * f_p * 4
    vmem_limit = int(min(max(vmem_need * 3 // 2, 32 << 20), _VMEM_LIMIT_CAP))

    m_bytes = cols_pad * f_p * csize if resident else num_i * cols_pad * f_p * csize
    cost = pl.CostEstimate(
        flops=int(2 * rows_pad * cols_pad * f_p),
        transcendentals=0,
        bytes_accessed=int(num_j * rows_pad * cols_pad * csize + m_bytes
                           + rows_pad * f_p * 4 + (f_p * 4 if has_bias else 0)),
    )

    kernel = functools.partial(_adj_mm_kernel, has_bias=has_bias,
                               resident=resident, tk=tk)
    return pl.pallas_call(
        kernel,
        out_shape=jax.ShapeDtypeStruct((rows_pad, f_p), jnp.float32),
        grid=grid,
        in_specs=in_specs,
        out_specs=pl.BlockSpec((tm, tn), lambda i, j, k: (i, j)),
        compiler_params=pltpu.CompilerParams(
            dimension_semantics=("parallel", "parallel", "arbitrary"),
            vmem_limit_bytes=vmem_limit),
        cost_estimate=cost,
    )(*args)


# ---------------------------------------------------------------------------
# Dense pass: out = A @ B (+ bias), tiled over rows / out-cols / reduction,
# f32 accumulation in a small VMEM scratch (output may be emitted in bf16).
# ---------------------------------------------------------------------------
def _dense_mm_kernel(*refs, has_bias):
    if has_bias:
        a_ref, b_ref, bias_ref, o_ref, acc_ref = refs
    else:
        a_ref, b_ref, o_ref, acc_ref = refs
        bias_ref = None
    k = pl.program_id(2)

    @pl.when(k == 0)
    def _init():
        acc_ref[...] = jnp.zeros_like(acc_ref)

    acc_ref[...] += jnp.dot(a_ref[...], b_ref[...], preferred_element_type=jnp.float32)

    @pl.when(k == pl.num_programs(2) - 1)
    def _finalize():
        r = acc_ref[...]
        if has_bias:
            r = r + bias_ref[...]
        o_ref[...] = r.astype(o_ref.dtype)


def _dense_matmul(a, b, bias, *, out_rows, out_cols, out_dtype):
    """pad(a) @ pad(b) (+ bias) -> (out_rows, out_cols) in out_dtype.

    a: (R, Ka) f32; b: (Kb, C) f32.  Ka/Kb may differ when `a` is already
    lane-padded -- the extra rows/cols are zero so the result is unchanged."""
    _, Ka = a.shape
    _, C = b.shape
    K = max(Ka, b.shape[0])
    if K <= 2048:
        tk1, k_pad = K, K                      # single reduction step, no K padding
    else:
        tk1 = 512
        k_pad = _round_up(K, tk1)

    tm1 = _divisor_tile(out_rows, 512)
    tn1 = _divisor_tile(out_cols, 512)

    a_p = _pad2(a, out_rows, k_pad, jnp.float32)
    b_p = _pad2(b, k_pad, out_cols, jnp.float32)

    grid = (out_rows // tm1, out_cols // tn1, k_pad // tk1)
    num_i, num_j, _ = grid
    has_bias = bias is not None

    in_specs = [pl.BlockSpec((tm1, tk1), lambda i, j, k: (i, k)),
                pl.BlockSpec((tk1, tn1), lambda i, j, k: (k, j))]
    args = [a_p, b_p]
    if has_bias:
        bias_p = _pad2(bias.reshape(1, -1), 1, out_cols, jnp.float32)
        in_specs.append(pl.BlockSpec((1, tn1), lambda i, j, k: (0, j)))
        args.append(bias_p)

    osize = jnp.dtype(out_dtype).itemsize
    vmem_need = (2 * (tm1 * tk1 * 4 + tk1 * tn1 * 4 + tm1 * tn1 * osize)
                 + tm1 * tn1 * 4 + (2 * out_cols * 4 if has_bias else 0))
    vmem_limit = int(min(max(vmem_need * 3 // 2, 32 << 20), _VMEM_LIMIT_CAP))

    cost = pl.CostEstimate(
        flops=int(2 * out_rows * k_pad * out_cols),
        transcendentals=0,
        bytes_accessed=int(num_j * out_rows * k_pad * 4
                           + num_i * k_pad * out_cols * 4
                           + out_rows * out_cols * osize
                           + (out_cols * 4 if has_bias else 0)),
    )

    kernel = functools.partial(_dense_mm_kernel, has_bias=has_bias)
    return pl.pallas_call(
        kernel,
        out_shape=jax.ShapeDtypeStruct((out_rows, out_cols), out_dtype),
        grid=grid,
        in_specs=in_specs,
        out_specs=pl.BlockSpec((tm1, tn1), lambda i, j, k: (i, j)),
        scratch_shapes=[pltpu.VMEM((tm1, tn1), jnp.float32)],
        compiler_params=pltpu.CompilerParams(
            dimension_semantics=("parallel", "parallel", "arbitrary"),
            vmem_limit_bytes=vmem_limit),
        cost_estimate=cost,
    )(*args)


# ---------------------------------------------------------------------------
# Public wrapper.
# ---------------------------------------------------------------------------
def graph_convolution(x, adj, weight, bias=None, *,
                      compute_dtype=jnp.bfloat16, order="auto"):
    """GCN layer forward: adj @ (x @ weight) + bias.

    x: (N, in_f), adj: (N, N) dense (row-normalized), weight: (in_f, out_f),
    bias: (out_f,) or None.  Returns (N, out_f) float32.

    compute_dtype: streaming dtype of the O(N^2) adjacency pass (bf16 default,
      f32 MXU accumulation; pass jnp.float32 for exact numerics).
    order: "xw_first"  -> adj @ (X @ W)   (classic)
           "adj_first" -> (adj @ X) @ W   (same result; cheaper when in_f < out_f)
           "auto"      -> stream the narrower width through the adjacency pass.

    Callers may pass `adj` already cast to compute_dtype (and N aligned to the
    tile sizes) to make the wrapper-side pad/cast a no-op.
    """
    N, in_f = x.shape
    in_f_w, out_f = weight.shape
    assert in_f_w == in_f and adj.shape == (N, N)
    if order == "auto":
        order = "adj_first" if in_f < out_f else "xw_first"
    assert order in ("xw_first", "adj_first")

    f_mid = out_f if order == "xw_first" else in_f   # width streamed through adj pass
    f_p = max(_round_up(f_mid, 128), 128)            # lane-dense
    csize = jnp.dtype(compute_dtype).itemsize

    tm, tk, tn = _adj_tiles(N, f_p)
    rows_pad = _round_up(N, tm)
    cols_pad = _round_up(N, tk)
    resident = (tn == f_p) and (cols_pad * f_p * csize <= _RESIDENT_BYTES)

    if order == "xw_first":
        # Pass 1: support = X @ W, rows padded to adj's column padding, emitted
        # in the streaming dtype (halves the pass-2 RHS traffic for bf16).
        support = _dense_matmul(x, weight, None, out_rows=cols_pad, out_cols=f_p,
                                out_dtype=compute_dtype)
        # Pass 2: out = adj @ support + bias (f32 output block is the accumulator).
        out_p = _adj_matmul(adj, support, bias, tm=tm, tk=tk, tn=tn,
                            rows_pad=rows_pad, cols_pad=cols_pad, f_p=f_p,
                            compute_dtype=compute_dtype, resident=resident)
    else:
        # Pass 1: Y = adj @ X (streams the narrower in_f width through the N^2 pass).
        x_p = _pad2(x, cols_pad, f_p, compute_dtype)
        y = _adj_matmul(adj, x_p, None, tm=tm, tk=tk, tn=tn,
                        rows_pad=rows_pad, cols_pad=cols_pad, f_p=f_p,
                        compute_dtype=compute_dtype, resident=resident)
        # Pass 2: out = Y @ W + bias (small relative cost, exact f32 path).
        out_fp = max(_round_up(out_f, 128), 128)
        out_p = _dense_matmul(y, weight, bias, out_rows=rows_pad, out_cols=out_fp,
                              out_dtype=jnp.float32)

    return out_p[:N, :out_f]


if __name__ == "__main__":
    # Shapes consistent with the module: N nodes = 8, in_features=16, out_features=32.
    N, in_features, out_features = 8, 16, 32

    key = jax.random.PRNGKey(0)
    k_x, k_adj, k_w, k_b = jax.random.split(key, 4)

    # Deterministic parameter init mirroring reset_parameters(): U(-stdv, stdv),
    # stdv = 1/sqrt(out_features).
    stdv = 1.0 / math.sqrt(out_features)
    weight = jax.random.uniform(k_w, (in_features, out_features), jnp.float32,
                                minval=-stdv, maxval=stdv)
    bias = jax.random.uniform(k_b, (out_features,), jnp.float32,
                              minval=-stdv, maxval=stdv)

    x = jax.random.normal(k_x, (N, in_features), jnp.float32)
    adj_raw = jax.random.uniform(k_adj, (N, N), jnp.float32)
    adj = adj_raw / jnp.sum(adj_raw, axis=1, keepdims=True)

    ref = adj @ (x @ weight) + bias[None, :]
    ref_nb = adj @ (x @ weight)

    # 1) Exact f32 streaming, both operand orderings.
    for order in ("xw_first", "adj_first"):
        out = jax.block_until_ready(graph_convolution(
            x, adj, weight, bias, compute_dtype=jnp.float32, order=order))
        assert out.shape == (N, out_features)
        assert jnp.allclose(out, ref, atol=1e-5, rtol=1e-5), f"f32 mismatch ({order})"

    # 2) No-bias path.
    out_nb = jax.block_until_ready(graph_convolution(
        x, adj, weight, None, compute_dtype=jnp.float32))
    assert jnp.allclose(out_nb, ref_nb, atol=1e-5, rtol=1e-5), "no-bias mismatch"

    # 3) Default bf16-streaming path (auto ordering), looser tolerance.
    out_bf16 = jax.block_until_ready(graph_convolution(x, adj, weight, bias))
    assert out_bf16.shape == (N, out_features)
    assert jnp.allclose(out_bf16, ref, atol=2e-2, rtol=2e-2), "bf16 mismatch"

    # 4) Multi-tile / megacore path on a slightly larger (still small) graph.
    N2, in2, out2 = 640, 48, 96
    k1, k2, k3, k4 = jax.random.split(jax.random.PRNGKey(1), 4)
    x2 = jax.random.normal(k1, (N2, in2), jnp.float32)
    adj2_raw = jax.random.uniform(k2, (N2, N2), jnp.float32)
    adj2 = adj2_raw / jnp.sum(adj2_raw, axis=1, keepdims=True)
    w2 = jax.random.uniform(k3, (in2, out2), jnp.float32, minval=-0.1, maxval=0.1)
    b2 = jax.random.uniform(k4, (out2,), jnp.float32, minval=-0.1, maxval=0.1)
    ref2 = adj2 @ (x2 @ w2) + b2[None, :]
    out2_ = jax.block_until_ready(graph_convolution(
        x2, adj2, w2, b2, compute_dtype=jnp.float32))
    assert out2_.shape == (N2, out2)
    assert jnp.allclose(out2_, ref2, atol=5e-3, rtol=5e-3), "multi-tile mismatch"

    print("KERNEL_OK")
</pallas_src>

<mosaic_0001>
module attributes {stable_mosaic.version = 11 : i64} {
  func.func @_dense_mm_kernel(%arg0: i32, %arg1: i32, %arg2: i32, %arg3: memref<8x16xf32, #tpu.memory_space<vmem>>, %arg4: memref<16x128xf32, #tpu.memory_space<vmem>>, %arg5: memref<8x128xf32, #tpu.memory_space<vmem>>, %arg6: memref<8x128xf32, #tpu.memory_space<vmem>>) attributes {dimension_semantics = [#tpu.dimension_semantics<parallel>, #tpu.dimension_semantics<parallel>, #tpu.dimension_semantics<arbitrary>], iteration_bounds = array<i64: 1, 1, 1>, scalar_prefetch = 0 : i64, scratch_operands = 1 : i64, tpu.core_type = #tpu.core_type<tc>, window_params = [{transform_indices = @transform_0, window_bounds = array<i64: 8, 16>}, {transform_indices = @transform_1, window_bounds = array<i64: 16, 128>}, {transform_indices = @transform_2, window_bounds = array<i64: 8, 128>}]} {
    %c0_i32 = arith.constant 0 : i32
    %0 = arith.cmpi eq, %arg2, %c0_i32 : i32
    %1 = arith.extui %0 : i1 to i32
    %c0_i32_0 = arith.constant 0 : i32
    %2 = arith.cmpi ne, %1, %c0_i32_0 : i32
    scf.if %2 {
      %cst_10 = arith.constant 0.000000e+00 : f32
      %12 = vector.broadcast %cst_10 : f32 to vector<8x128xf32>
      %c0_11 = arith.constant 0 : index
      %c0_12 = arith.constant 0 : index
      %13 = vector.load %arg6[%c0_11, %c0_12] : memref<8x128xf32, #tpu.memory_space<vmem>>, vector<8x128xf32>
      tpu.vector_store %arg6[%c0_11, %c0_12], %12 {strides = array<i32>} : memref<8x128xf32, #tpu.memory_space<vmem>>, vector<8x128xf32>,
    } else {
    }
    %c0 = arith.constant 0 : index
    %c0_1 = arith.constant 0 : index
    %3 = vector.load %arg6[%c0, %c0_1] : memref<8x128xf32, #tpu.memory_space<vmem>>, vector<8x128xf32>
    %c0_2 = arith.constant 0 : index
    %c0_3 = arith.constant 0 : index
    %4 = vector.load %arg3[%c0_2, %c0_3] : memref<8x16xf32, #tpu.memory_space<vmem>>, vector<8x16xf32>
    %c0_4 = arith.constant 0 : index
    %c0_5 = arith.constant 0 : index
    %5 = vector.load %arg4[%c0_4, %c0_5] : memref<16x128xf32, #tpu.memory_space<vmem>>, vector<16x128xf32>
    %cst = arith.constant dense<0.000000e+00> : vector<8x128xf32>
    %6 = tpu.matmul %4, %5, %cst {dimension_numbers = #tpu.dot_dimension_numbers<[1], [0], [0], [1], [0, 0, 1, 1], [], []>} : vector<8x16xf32>, vector<16x128xf32>, vector<8x128xf32> -> vector<8x128xf32>
    %7 = arith.addf %3, %6 : vector<8x128xf32>
    %c0_6 = arith.constant 0 : index
    %c0_7 = arith.constant 0 : index
    %8 = vector.load %arg6[%c0_6, %c0_7] : memref<8x128xf32, #tpu.memory_space<vmem>>, vector<8x128xf32>
    tpu.vector_store %arg6[%c0_6, %c0_7], %7 {strides = array<i32>} : memref<8x128xf32, #tpu.memory_space<vmem>>, vector<8x128xf32>,
    %c0_i32_8 = arith.constant 0 : i32
    %9 = arith.cmpi eq, %arg2, %c0_i32_8 : i32
    %10 = arith.extui %9 : i1 to i32
    %c0_i32_9 = arith.constant 0 : i32
    %11 = arith.cmpi ne, %10, %c0_i32_9 : i32
    scf.if %11 {
      %c0_10 = arith.constant 0 : index
      %c0_11 = arith.constant 0 : index
      %12 = vector.load %arg6[%c0_10, %c0_11] : memref<8x128xf32, #tpu.memory_space<vmem>>, vector<8x128xf32>
      %c0_12 = arith.constant 0 : index
      %c0_13 = arith.constant 0 : index
      %13 = vector.load %arg5[%c0_12, %c0_13] : memref<8x128xf32, #tpu.memory_space<vmem>>, vector<8x128xf32>
      tpu.vector_store %arg5[%c0_12, %c0_13], %12 {strides = array<i32>} : memref<8x128xf32, #tpu.memory_space<vmem>>, vector<8x128xf32>,
    } else {
    }
    return
  }
  func.func @transform_0(%arg0: i32, %arg1: i32, %arg2: i32) -> (i32, i32) {
    %c0_i32 = arith.constant 0 : i32
    return %arg0, %arg2 : i32, i32
  }
  func.func @transform_1(%arg0: i32, %arg1: i32, %arg2: i32) -> (i32, i32) {
    %c0_i32 = arith.constant 0 : i32
    return %arg2, %arg1 : i32, i32
  }
  func.func @transform_2(%arg0: i32, %arg1: i32, %arg2: i32) -> (i32, i32) {
    %c0_i32 = arith.constant 0 : i32
    return %arg0, %arg1 : i32, i32
  }
}

</mosaic_0001>

<bundles_post_ra>
// kernel: tpu_custom_call.1
= control target key start
LH: loop header
LB: loop body
LE: loop exit
PB: predicated region body
PF: predicated region fallthrough
CT: control target
= control target key end

     0   :  { %7 = vsyncpa [#allocation4], 0  ;;  %s213_s0 = inlined_call_operand.hbm [shape: f32[8,16], index: 0, kind: input, shape index: {}]   ;;  %s214_s1 = inlined_call_operand.hbm [shape: f32[16,128], index: 1, kind: input, shape index: {}]   ;;  %s215_s2 = inlined_call_operand.hbm [shape: f32[8,128], index: 2, kind: output, shape index: {}]  }
   0x1   :  { %8 = vsyncpa [#allocation7], 0 }
   0x2   :  { %9 = vsyncpa [#allocation5], 0  ;;  %s15_s11 = sshll.u32 %s213_s0, 4  ;;  %s184_s12 = smov [#allocation3]   ;;  %s16_s11 = int_to_ptr.hbm [resolvable:$true] %s15_s11 }
   0x3   :  { %s17_s13 = sshll.u32 %s184_s12, 4  ;;  %s25_s16 = sshll.u32 %s214_s1, 4  ;;  %s18_s13 = int_to_ptr.vmem [resolvable:$true] %s17_s13  ;;  %s26_s16 = int_to_ptr.hbm [resolvable:$true] %s25_s16 }
   0x4   :  { %20 = dma.hbm_to_vmem [thread:$0]  %s16_s11, 128, %s18_s13, [#allocation4]  }
   0x5   :  { %s185_s17 = smov [#allocation6]   ;;  %s186_s19 = smov 128  }
   0x6   :  { %s27_s18 = sshll.u32 %s185_s17, 4  ;;  %s187_s20 = smov 8   ;;  %s28_s18 = int_to_ptr.vmem [resolvable:$true] %s27_s18 }
   0x7   :  { %33 = dma.hbm_to_vmem [thread:$0]  %s26_s16, 256, %s28_s18, [#allocation7], %s186_s19, %s186_s19, %s187_s20  }
   0x8   :  { %178 = dma.done.wait [#allocation4], 128  }
   0x9   :  { %179 = vsyncadd [#allocation4], 4294967168 }
   0xa   :  { %180 = dma.done.wait [#allocation7], 256  }
   0xb   :  { %181 = vsyncadd [#allocation7], 4294967040  ;;  %v50_v0 = vld [vmem:[#allocation6 + $0x8] sm:$0xff]  ;;  %v49_v1 = vld [vmem:[#allocation6] sm:$0xff]  ;;  %vm51_vm0 = vcmask 130048   ;;  %s188_s0 = smov [#allocation8]  }
   0xc   :  { %69 = vmatpush.msra.mxu0 %v50_v0  ;;  %v48_v2 = vld [vmem:[#allocation3] sm:$0xff]  ;;  %s87_s1 = sshll.u32 %s188_s0, 4  ;;  %s89_s23 = sshll.u32 %s215_s2, 4  ;;  %s88_s1 = int_to_ptr.vmem [resolvable:$true] %s87_s1  ;;  %s90_s23 = int_to_ptr.hbm [resolvable:$true] %s89_s23 }
   0xe   :  { %70 = vmatpush.msra.mxu0 %v49_v1 }
   0xf   :  { %100 = vmatmul.msk.f32.vlgmr.msra.gmra.mxu0 %vm51_vm0, %v48_v2 }
  0x8c   :  { %v72_v3 = vpop.f32.mrf.mxu0 }
  0x8d   :  { %81 = vst [vmem:[#allocation8] sm:$0xff] %v72_v3 }
  0x8e   :  { %92 = dma.vmem_to_hbm [thread:$0]  %s88_s1, 128, %s90_s23, [#allocation5]  }
  0x8f   :  { %182 = dma.done.wait [#allocation5], 128  }
  0x90   :  { %183 = vsyncadd [#allocation5], 4294967168 }
  0x91   :  { %97 = vsyncpa [#allocation4], 1 }
  0x92   :  { %98 = vsyncpa [#allocation7], 1 }
  0x93   :  { %99 = vsyncpa [#allocation5], 1 }

</bundles_post_ra>
